<compile_context>
chip_gen: v6e
topology: v6e:2x2x1
jax: 0.10.0
libtpu: 0.0.40
codegen_flags: <defaults>
</compile_context>

<pallas_src>
import functools

import jax
import jax.numpy as jnp
from jax.experimental import pallas as pl
from jax.experimental.pallas import tpu as pltpu

IN_DIM = 512
H1_DIM = 256
H2_DIM = 84
OUT_DIM = 16

H2_PAD = 128     # 84 -> 128 lanes (zero-padded weights/bias: inert)
OUT_PAD = 128    # 16 -> 128 lanes for the fc3 weight / logits
TILE_B = 1024    # max rows per grid step (sweep 512/1024/2048)


def _round_up(n, m):
    return ((n + m - 1) // m) * m


def _choose_tile_b(batch, max_tile=TILE_B):
    """Adaptive batch tile: small batches don't pad to max_tile; mid-size batches
    get split into >=2 grid steps so v7x's two TensorCores both get work."""
    pad = _round_up(batch, 16)          # 16 rows: bf16 sublane packing after in-kernel cast
    if pad <= 16:
        return 16
    if pad <= max_tile:
        return _round_up(pl.cdiv(pad, 2), 16)
    return max_tile


def mlp_softmax_kernel(x_ref, w1_ref, b1_ref, w2_ref, b2_ref, w3_ref, b3_ref,
                       o_ref, *, out_dim):
    # fc1 + relu: cast x f32->bf16 in-kernel (VPU filler hidden under DMA/MXU),
    # bf16 matmul with f32 accumulation, f32 epilogue.
    x = x_ref[...].astype(w1_ref.dtype)
    h1 = jnp.dot(x, w1_ref[...], preferred_element_type=jnp.float32)
    h1 = jnp.maximum(h1 + b1_ref[...], 0.0)
    # fc2 + relu
    h2 = jnp.dot(h1.astype(w2_ref.dtype), w2_ref[...],
                 preferred_element_type=jnp.float32)
    h2 = jnp.maximum(h2 + b2_ref[...], 0.0)
    # fc3
    logits = jnp.dot(h2.astype(w3_ref.dtype), w3_ref[...],
                     preferred_element_type=jnp.float32)
    logits = logits + b3_ref[...]
    # Softmax over the feature dim (f32). Padded lanes have logit == 0 (zero weight/bias),
    # which only raises the stability shift `m`; their exp contributions are zeroed below,
    # so the normalization over the 16 valid lanes is exact.
    m = jnp.max(logits, axis=-1, keepdims=True)
    e = jnp.exp(logits - m)
    col = jax.lax.broadcasted_iota(jnp.int32, e.shape, 1)
    e = jnp.where(col < out_dim, e, 0.0)
    probs = e * pl.reciprocal(jnp.sum(e, axis=-1, keepdims=True), approx=True)
    # Store only the 16 valid probability lanes (64 B/row instead of 512 B/row).
    o_ref[...] = probs[:, :out_dim]


def prepare_params(w1, b1, w2, b2, w3, b3, compute_dtype=jnp.bfloat16):
    """Pad ragged dims to 128 lanes with zeros and cast weights to bf16.
    Call ONCE and reuse across forwards (pure overhead if redone per call)."""
    w1c = w1.astype(compute_dtype)
    b1c = jnp.asarray(b1, jnp.float32).reshape(1, H1_DIM)
    w2p = jnp.zeros((H1_DIM, H2_PAD), compute_dtype).at[:, :H2_DIM].set(
        w2.astype(compute_dtype))
    b2p = jnp.zeros((1, H2_PAD), jnp.float32).at[:, :H2_DIM].set(
        jnp.asarray(b2, jnp.float32).reshape(1, H2_DIM))
    w3p = jnp.zeros((H2_PAD, OUT_PAD), compute_dtype).at[:H2_DIM, :OUT_DIM].set(
        w3.astype(compute_dtype))
    b3p = jnp.zeros((1, OUT_PAD), jnp.float32).at[:, :OUT_DIM].set(
        jnp.asarray(b3, jnp.float32).reshape(1, OUT_DIM))
    return w1c, b1c, w2p, b2p, w3p, b3p


def classifier_forward(x, w1c, b1c, w2p, b2p, w3p, b3p, *, max_tile_b=TILE_B):
    """x: (B, 512) f32. Prepared (padded/cast) params from prepare_params().
    Returns (B, 16) f32 softmax probabilities."""
    B = x.shape[0]
    tile_b = _choose_tile_b(B, max_tile_b)
    pad_b = _round_up(B, tile_b)
    xp = x if pad_b == B else jnp.pad(x, ((0, pad_b - B), (0, 0)))

    grid = (pad_b // tile_b,)

    out = pl.pallas_call(
        functools.partial(mlp_softmax_kernel, out_dim=OUT_DIM),
        out_shape=jax.ShapeDtypeStruct((pad_b, OUT_DIM), jnp.float32),
        grid=grid,
        in_specs=[
            # x: new batch tile every grid step (auto double-buffered pipeline), stays f32
            pl.BlockSpec((tile_b, IN_DIM), lambda i: (i, 0)),
            # weights/biases: constant block index -> resident in VMEM, fetched once
            pl.BlockSpec((IN_DIM, H1_DIM), lambda i: (0, 0)),
            pl.BlockSpec((1, H1_DIM), lambda i: (0, 0)),
            pl.BlockSpec((H1_DIM, H2_PAD), lambda i: (0, 0)),
            pl.BlockSpec((1, H2_PAD), lambda i: (0, 0)),
            pl.BlockSpec((H2_PAD, OUT_PAD), lambda i: (0, 0)),
            pl.BlockSpec((1, OUT_PAD), lambda i: (0, 0)),
        ],
        # Lane-narrow (16) output block == full array width, so the spec is legal;
        # writes 64 B/row instead of 512 B/row.
        out_specs=pl.BlockSpec((tile_b, OUT_DIM), lambda i: (i, 0)),
        compiler_params=pltpu.CompilerParams(
            dimension_semantics=("parallel",)),
    )(xp, w1c, b1c, w2p, b2p, w3p, b3p)

    return out[:B] if pad_b != B else out


def init_params(key):
    # Deterministic synthetic init mimicking torch's uniform(-1/sqrt(fan_in), +)
    def linear(key, fan_in, fan_out):
        kw, kb = jax.random.split(key)
        bound = 1.0 / jnp.sqrt(fan_in)
        w = jax.random.uniform(kw, (fan_in, fan_out), jnp.float32,
                               minval=-bound, maxval=bound)
        b = jax.random.uniform(kb, (1, fan_out), jnp.float32,
                               minval=-bound, maxval=bound)
        return w, b

    k1, k2, k3 = jax.random.split(key, 3)
    w1, b1 = linear(k1, IN_DIM, H1_DIM)
    w2, b2 = linear(k2, H1_DIM, H2_DIM)
    w3, b3 = linear(k3, H2_DIM, OUT_DIM)
    return w1, b1, w2, b2, w3, b3


def reference_forward(x, w1, b1, w2, b2, w3, b3):
    h1 = jnp.maximum(x @ w1 + b1, 0.0)
    h2 = jnp.maximum(h1 @ w2 + b2, 0.0)
    logits = h2 @ w3 + b3
    return jax.nn.softmax(logits, axis=1)


if __name__ == "__main__":
    key = jax.random.PRNGKey(0)
    k_x, k_p = jax.random.split(key)

    B = 8
    x = jax.random.normal(k_x, (B, IN_DIM), jnp.float32)
    params = init_params(k_p)

    # Hoisted once (not per forward call).
    prepared = prepare_params(*params)

    out = classifier_forward(x, *prepared)
    out = jax.block_until_ready(out)

    ref = reference_forward(x, *params)
    assert out.shape == (B, OUT_DIM)
    # bf16 matmuls + approx reciprocal -> looser tolerance than a pure f32 path.
    assert jnp.allclose(out, ref, atol=3e-2, rtol=3e-2), (
        f"max abs err {jnp.max(jnp.abs(out - ref))}")
    assert jnp.allclose(jnp.sum(out, axis=1), jnp.ones((B,)), atol=2e-3)
    assert jnp.array_equal(jnp.argmax(out, axis=1), jnp.argmax(ref, axis=1))

    print("KERNEL_OK")
</pallas_src>

<mosaic_0001>
module attributes {stable_mosaic.version = 11 : i64} {
  func.func @mlp_softmax_kernel(%arg0: i32, %arg1: memref<16x512xf32, #tpu.memory_space<vmem>>, %arg2: memref<512x256xbf16, #tpu.memory_space<vmem>>, %arg3: memref<1x256xf32, #tpu.memory_space<vmem>>, %arg4: memref<256x128xbf16, #tpu.memory_space<vmem>>, %arg5: memref<1x128xf32, #tpu.memory_space<vmem>>, %arg6: memref<128x128xbf16, #tpu.memory_space<vmem>>, %arg7: memref<1x128xf32, #tpu.memory_space<vmem>>, %arg8: memref<16x16xf32, #tpu.memory_space<vmem>>) attributes {dimension_semantics = [#tpu.dimension_semantics<parallel>], iteration_bounds = array<i64: 1>, scalar_prefetch = 0 : i64, scratch_operands = 0 : i64, tpu.core_type = #tpu.core_type<tc>, window_params = [{transform_indices = @transform_0, window_bounds = array<i64: 16, 512>}, {pipeline_mode = #tpu.pipeline_mode<synchronous>, transform_indices = @transform_1, window_bounds = array<i64: 512, 256>}, {pipeline_mode = #tpu.pipeline_mode<synchronous>, transform_indices = @transform_2, window_bounds = array<i64: 1, 256>}, {pipeline_mode = #tpu.pipeline_mode<synchronous>, transform_indices = @transform_3, window_bounds = array<i64: 256, 128>}, {pipeline_mode = #tpu.pipeline_mode<synchronous>, transform_indices = @transform_4, window_bounds = array<i64: 1, 128>}, {pipeline_mode = #tpu.pipeline_mode<synchronous>, transform_indices = @transform_5, window_bounds = array<i64: 128, 128>}, {pipeline_mode = #tpu.pipeline_mode<synchronous>, transform_indices = @transform_6, window_bounds = array<i64: 1, 128>}, {transform_indices = @transform_7, window_bounds = array<i64: 16, 16>}]} {
    %c0 = arith.constant 0 : index
    %c0_0 = arith.constant 0 : index
    %0 = vector.load %arg1[%c0, %c0_0] : memref<16x512xf32, #tpu.memory_space<vmem>>, vector<16x512xf32>
    %1 = arith.truncf %0 : vector<16x512xf32> to vector<16x512xbf16>
    %c0_1 = arith.constant 0 : index
    %c0_2 = arith.constant 0 : index
    %2 = vector.load %arg2[%c0_1, %c0_2] : memref<512x256xbf16, #tpu.memory_space<vmem>>, vector<512x256xbf16>
    %cst = arith.constant dense<0.000000e+00> : vector<16x256xf32>
    %3 = tpu.matmul %1, %2, %cst {dimension_numbers = #tpu.dot_dimension_numbers<[1], [0], [0], [1], [0, 0, 1, 1], [], []>} : vector<16x512xbf16>, vector<512x256xbf16>, vector<16x256xf32> -> vector<16x256xf32>
    %c0_3 = arith.constant 0 : index
    %c0_4 = arith.constant 0 : index
    %4 = vector.load %arg3[%c0_3, %c0_4] : memref<1x256xf32, #tpu.memory_space<vmem>>, vector<1x256xf32>
    %5 = vector.broadcast %4 : vector<1x256xf32> to vector<16x256xf32>
    %6 = arith.addf %3, %5 : vector<16x256xf32>
    %cst_5 = arith.constant 0.000000e+00 : f32
    %7 = vector.broadcast %cst_5 : f32 to vector<16x256xf32>
    %8 = arith.maximumf %6, %7 : vector<16x256xf32>
    %9 = arith.truncf %8 : vector<16x256xf32> to vector<16x256xbf16>
    %c0_6 = arith.constant 0 : index
    %c0_7 = arith.constant 0 : index
    %10 = vector.load %arg4[%c0_6, %c0_7] : memref<256x128xbf16, #tpu.memory_space<vmem>>, vector<256x128xbf16>
    %cst_8 = arith.constant dense<0.000000e+00> : vector<16x128xf32>
    %11 = tpu.matmul %9, %10, %cst_8 {dimension_numbers = #tpu.dot_dimension_numbers<[1], [0], [0], [1], [0, 0, 1, 1], [], []>} : vector<16x256xbf16>, vector<256x128xbf16>, vector<16x128xf32> -> vector<16x128xf32>
    %c0_9 = arith.constant 0 : index
    %c0_10 = arith.constant 0 : index
    %12 = vector.load %arg5[%c0_9, %c0_10] : memref<1x128xf32, #tpu.memory_space<vmem>>, vector<1x128xf32>
    %13 = vector.broadcast %12 : vector<1x128xf32> to vector<16x128xf32>
    %14 = arith.addf %11, %13 : vector<16x128xf32>
    %cst_11 = arith.constant 0.000000e+00 : f32
    %15 = vector.broadcast %cst_11 : f32 to vector<16x128xf32>
    %16 = arith.maximumf %14, %15 : vector<16x128xf32>
    %17 = arith.truncf %16 : vector<16x128xf32> to vector<16x128xbf16>
    %c0_12 = arith.constant 0 : index
    %c0_13 = arith.constant 0 : index
    %18 = vector.load %arg6[%c0_12, %c0_13] : memref<128x128xbf16, #tpu.memory_space<vmem>>, vector<128x128xbf16>
    %cst_14 = arith.constant dense<0.000000e+00> : vector<16x128xf32>
    %19 = tpu.matmul %17, %18, %cst_14 {dimension_numbers = #tpu.dot_dimension_numbers<[1], [0], [0], [1], [0, 0, 1, 1], [], []>} : vector<16x128xbf16>, vector<128x128xbf16>, vector<16x128xf32> -> vector<16x128xf32>
    %c0_15 = arith.constant 0 : index
    %c0_16 = arith.constant 0 : index
    %20 = vector.load %arg7[%c0_15, %c0_16] : memref<1x128xf32, #tpu.memory_space<vmem>>, vector<1x128xf32>
    %21 = vector.broadcast %20 : vector<1x128xf32> to vector<16x128xf32>
    %22 = arith.addf %19, %21 : vector<16x128xf32>
    %cst_17 = arith.constant dense<0xFF800000> : vector<16xf32>
    %23 = vector.multi_reduction <maximumf>, %22, %cst_17 [1] : vector<16x128xf32> to vector<16xf32>
    %24 = vector.shape_cast %23 : vector<16xf32> to vector<16x1xf32>
    %25 = vector.broadcast %24 : vector<16x1xf32> to vector<16x128xf32>
    %26 = arith.subf %22, %25 : vector<16x128xf32>
    %27 = math.exp %26 : vector<16x128xf32>
    %28 = tpu.iota {dimensions = array<i32: 1>} : vector<16x128xi32>
    %c16_i32 = arith.constant 16 : i32
    %29 = vector.broadcast %c16_i32 : i32 to vector<16x128xi32>
    %30 = arith.cmpi slt, %28, %29 : vector<16x128xi32>
    %cst_18 = arith.constant 0.000000e+00 : f32
    %31 = vector.broadcast %cst_18 : f32 to vector<16x128xf32>
    %32 = arith.select %30, %27, %31 : vector<16x128xi1>, vector<16x128xf32>
    %cst_19 = arith.constant dense<0.000000e+00> : vector<16xf32>
    %33 = vector.multi_reduction <add>, %32, %cst_19 [1] : vector<16x128xf32> to vector<16xf32>
    %34 = vector.shape_cast %33 : vector<16xf32> to vector<16x1xf32>
    %35 = tpu.reciprocal %34 {approx = true} : vector<16x1xf32> -> vector<16x1xf32>
    %36 = vector.broadcast %35 : vector<16x1xf32> to vector<16x128xf32>
    %37 = arith.mulf %32, %36 : vector<16x128xf32>
    %38 = vector.extract_strided_slice %37 {offsets = [0, 0], sizes = [16, 16], strides = [1, 1]} : vector<16x128xf32> to vector<16x16xf32>
    %c0_20 = arith.constant 0 : index
    %c0_21 = arith.constant 0 : index
    %39 = vector.load %arg8[%c0_20, %c0_21] : memref<16x16xf32, #tpu.memory_space<vmem>>, vector<16x16xf32>
    tpu.vector_store %arg8[%c0_20, %c0_21], %38 {strides = array<i32>} : memref<16x16xf32, #tpu.memory_space<vmem>>, vector<16x16xf32>,
    return
  }
  func.func @transform_0(%arg0: i32) -> (i32, i32) {
    %c0_i32 = arith.constant 0 : i32
    %c0_i32_0 = arith.constant 0 : i32
    return %arg0, %c0_i32 : i32, i32
  }
  func.func @transform_1(%arg0: i32) -> (i32, i32) {
    %c0_i32 = arith.constant 0 : i32
    %c0_i32_0 = arith.constant 0 : i32
    %c0_i32_1 = arith.constant 0 : i32
    return %c0_i32, %c0_i32_0 : i32, i32
  }
  func.func @transform_2(%arg0: i32) -> (i32, i32) {
    %c0_i32 = arith.constant 0 : i32
    %c0_i32_0 = arith.constant 0 : i32
    %c0_i32_1 = arith.constant 0 : i32
    return %c0_i32, %c0_i32_0 : i32, i32
  }
  func.func @transform_3(%arg0: i32) -> (i32, i32) {
    %c0_i32 = arith.constant 0 : i32
    %c0_i32_0 = arith.constant 0 : i32
    %c0_i32_1 = arith.constant 0 : i32
    return %c0_i32, %c0_i32_0 : i32, i32
  }
  func.func @transform_4(%arg0: i32) -> (i32, i32) {
    %c0_i32 = arith.constant 0 : i32
    %c0_i32_0 = arith.constant 0 : i32
    %c0_i32_1 = arith.constant 0 : i32
    return %c0_i32, %c0_i32_0 : i32, i32
  }
  func.func @transform_5(%arg0: i32) -> (i32, i32) {
    %c0_i32 = arith.constant 0 : i32
    %c0_i32_0 = arith.constant 0 : i32
    %c0_i32_1 = arith.constant 0 : i32
    return %c0_i32, %c0_i32_0 : i32, i32
  }
  func.func @transform_6(%arg0: i32) -> (i32, i32) {
    %c0_i32 = arith.constant 0 : i32
    %c0_i32_0 = arith.constant 0 : i32
    %c0_i32_1 = arith.constant 0 : i32
    return %c0_i32, %c0_i32_0 : i32, i32
  }
  func.func @transform_7(%arg0: i32) -> (i32, i32) {
    %c0_i32 = arith.constant 0 : i32
    %c0_i32_0 = arith.constant 0 : i32
    return %arg0, %c0_i32 : i32, i32
  }
}

</mosaic_0001>

<bundles_post_ra>
// kernel: tpu_custom_call.1
= control target key start
LH: loop header
LB: loop body
LE: loop exit
PB: predicated region body
PF: predicated region fallthrough
CT: control target
= control target key end

     0   :  { %12 = vsyncpa [#allocation3], 0  ;;  %s1394_s0 = inlined_call_operand.hbm [shape: f32[16,512], index: 0, kind: input, shape index: {}]   ;;  %s1395_s1 = inlined_call_operand.hbm [shape: bf16[512,256], index: 1, kind: input, shape index: {}]   ;;  %s1396_s2 = inlined_call_operand.vmem [shape: f32[1,256], index: 2, kind: input, shape index: {}]   ;;  %s1397_s3 = inlined_call_operand.hbm [shape: bf16[256,128], index: 3, kind: input, shape index: {}]   ;;  %s1398_s4 = inlined_call_operand.vmem [shape: f32[1,128], index: 4, kind: input, shape index: {}]   ;;  %s1399_s5 = inlined_call_operand.hbm [shape: bf16[128,128], index: 5, kind: input, shape index: {}]   ;;  %s1400_s6 = inlined_call_operand.vmem [shape: f32[1,128], index: 6, kind: input, shape index: {}]   ;;  %s1401_s7 = inlined_call_operand.hbm [shape: f32[16,16], index: 7, kind: output, shape index: {}]  }
   0x1   :  { %13 = vsyncpa [#allocation6], 0 }
   0x2   :  { %14 = vsyncpa [#allocation9], 0 }
   0x3   :  { %15 = vsyncpa [#allocation4], 0  ;;  %s1309_s24 = smov [#allocation5]  }
   0x4   :  { %s33_s25 = sshll.u32 %s1309_s24, 4  ;;  %s34_s25 = int_to_ptr.vmem [resolvable:$true] %s33_s25 }
   0x5   :  { %s1209_s26 = scalar_lea.vmem %s34_s25, 8192  ;;  %p1214_p1 = scmp.lt.s32.totalorder %s34_s25, %s34_s25 }
   0x6   :  { %p1210_p0 = scmp.ne.s32.totalorder %s34_s25, %s1209_s26  ;;  %p1215_p2 = scmp.lt.s32.totalorder %s1209_s26, %s1209_s26 }
   0x8   :  { %p1216_p3 = por %p1215_p2, %p1214_p1 }
   0xa   :  { %p1217_p4 = pnand %p1216_p3, %p1210_p0 }
   0xc   :  { %1220 = shalt.err (!%p1217_p4)
}
   0xd   :  { %s1310_s27 = smov 128   ;;  %s1311_s28 = smov 8  }
   0xe   :  { %39 = dma.hbm_to_vmem [thread:$0]  %s1395_s1, 8192, %s34_s25, [#allocation6], %s1310_s27, %s1310_s27, %s1311_s28  }
   0xf   :  { %s1312_s8 = smov [#allocation2]  }
  0x10   :  { %s21_s9 = sshll.u32 %s1312_s8, 4  ;;  %s22_s9 = int_to_ptr.vmem [resolvable:$true] %s21_s9 }
  0x11   :  { %s1229_s10 = scalar_lea.vmem %s22_s9, 1024  ;;  %p1234_p6 = scmp.lt.s32.totalorder %s22_s9, %s22_s9 }
  0x12   :  { %p1230_p5 = scmp.ne.s32.totalorder %s22_s9, %s1229_s10  ;;  %p1235_p7 = scmp.lt.s32.totalorder %s1229_s10, %s1229_s10 }
  0x14   :  { %p1236_p8 = por %p1235_p7, %p1234_p6 }
  0x16   :  { %p1237_p9 = pnand %p1236_p8, %p1230_p5 }
  0x18   :  { %1240 = shalt.err (!%p1237_p9)
}
  0x19   :  { %s1313_s11 = smov 512   ;;  %s1314_s12 = smov 32  }
  0x1a   :  { %27 = dma.hbm_to_vmem [thread:$0]  %s1394_s0, 1024, %s22_s9, [#allocation3], %s1313_s11, %s1313_s11, %s1314_s12  }
  0x1b   :  { %s1315_s15 = smov [#allocation7]  }
  0x1c   :  { %s47_s16 = sshll.u32 %s1315_s15, 4  ;;  %s48_s16 = int_to_ptr.vmem [resolvable:$true] %s47_s16 }
  0x1d   :  { %s1249_s1 = scalar_lea.vmem %s48_s16, 2048  ;;  %p1254_p11 = scmp.lt.s32.totalorder %s48_s16, %s48_s16 }
  0x1e   :  { %p1250_p10 = scmp.ne.s32.totalorder %s48_s16, %s1249_s1  ;;  %p1255_p12 = scmp.lt.s32.totalorder %s1249_s1, %s1249_s1 }
  0x20   :  { %p1256_p13 = por %p1255_p12, %p1254_p11 }
  0x22   :  { %p1257_p0 = pnand %p1256_p13, %p1250_p10 }
  0x24   :  { %1260 = shalt.err (!%p1257_p0)
}
  0x25   :  { %s1316_s17 = smov 64   ;;  %s1317_s18 = smov 4  }
  0x26   :  { %53 = dma.hbm_to_vmem [thread:$0]  %s1397_s3, 2048, %s48_s16, [#allocation6], %s1316_s17, %s1316_s17, %s1317_s18  }
  0x27   :  { %s1318_s21 = smov [#allocation8]  }
  0x28   :  { %s61_s22 = sshll.u32 %s1318_s21, 4  ;;  %s62_s22 = int_to_ptr.vmem [resolvable:$true] %s61_s22 }
  0x29   :  { %s1269_s0 = scalar_lea.vmem %s62_s22, 1024  ;;  %p1274_p2 = scmp.lt.s32.totalorder %s62_s22, %s62_s22 }
  0x2a   :  { %p1270_p1 = scmp.ne.s32.totalorder %s62_s22, %s1269_s0  ;;  %p1275_p3 = scmp.lt.s32.totalorder %s1269_s0, %s1269_s0 }
  0x2c   :  { %p1276_p4 = por %p1275_p3, %p1274_p2 }
  0x2e   :  { %p1277_p5 = pnand %p1276_p4, %p1270_p1 }
  0x30   :  { %1280 = shalt.err (!%p1277_p5)
}
  0x31   :  { %67 = dma.hbm_to_vmem [thread:$0]  %s1399_s5, 1024, %s62_s22, [#allocation9], %s1316_s17, %s1316_s17, %s1317_s18  }
  0x32   :  { %1301 = dma.done.wait [#allocation3], 1024  }
  0x33   :  { %1302 = vsyncadd [#allocation3], 4294966272 }
  0x34   :  { %1303 = dma.done.wait [#allocation6], 10240  }
  0x35   :  { %1304 = vsyncadd [#allocation6], 4294957056 }
  0x36   :  { %1305 = dma.done.wait [#allocation9], 1024  }
  0x37   :  { %1306 = vsyncadd [#allocation9], 4294966272  ;;  %v1073_v0 = vld [vmem:[#allocation5 + $0x74] ss:$8 sps:$4 sm:$0xff]   ;;  %v1077_v2 = vld [vmem:[#allocation5 + $0x70] ss:$8 sps:$4 sm:$0xff]  }
  0x38   :  { %v1075_v1 = vld [vmem:[#allocation5 + $0x174] ss:$8 sps:$4 sm:$0xff]   ;;  %491 = vmatprep.subr.bf16.mxu0 %v1073_v0  ;;  %v1078_v3 = vld [vmem:[#allocation5 + $0x170] ss:$8 sps:$4 sm:$0xff]   ;;  %v1079_v4 = vld [vmem:[#allocation5 + $0x64] ss:$8 sps:$4 sm:$0xff]  }
  0x39   :  { %534 = vmatprep.subr.bf16.mxu1 %v1075_v1  ;;  %492 = vmatpush1.bf16.msra.mxu0 %v1077_v2  ;;  %v1081_v5 = vld [vmem:[#allocation5 + $0x164] ss:$8 sps:$4 sm:$0xff]   ;;  %v1083_v6 = vld [vmem:[#allocation5 + $0x60] ss:$8 sps:$4 sm:$0xff]   ;;  %v1085_v8 = vld [vmem:[#allocation5 + $0x54] ss:$8 sps:$4 sm:$0xff]  }
  0x3a   :  { %535 = vmatpush1.bf16.msra.mxu1 %v1078_v3  ;;  %493 = vmatprep.subr.bf16.mxu0 %v1079_v4  ;;  %v1084_v7 = vld [vmem:[#allocation5 + $0x160] ss:$8 sps:$4 sm:$0xff]   ;;  %v1087_v9 = vld [vmem:[#allocation5 + $0x154] ss:$8 sps:$4 sm:$0xff]   ;;  %v1089_v10 = vld [vmem:[#allocation5 + $0x50] ss:$8 sps:$4 sm:$0xff]  }
  0x3b   :  { %536 = vmatprep.subr.bf16.mxu1 %v1081_v5  ;;  %v1090_v11 = vld [vmem:[#allocation5 + $0x150] ss:$8 sps:$4 sm:$0xff]   ;;  %v1091_v12 = vld [vmem:[#allocation5 + $0x44] ss:$8 sps:$4 sm:$0xff]   ;;  %v1095_v14 = vld [vmem:[#allocation5 + $0x40] ss:$8 sps:$4 sm:$0xff]  }
  0x3c   :  { %v1093_v13 = vld [vmem:[#allocation5 + $0x144] ss:$8 sps:$4 sm:$0xff]   ;;  %v1096_v15 = vld [vmem:[#allocation5 + $0x140] ss:$8 sps:$4 sm:$0xff]   ;;  %v1097_v16 = vld [vmem:[#allocation5 + $0x34] ss:$8 sps:$4 sm:$0xff]  }
  0x3d   :  { %494 = vmatpush1.bf16.msra.mxu0 %v1083_v6  ;;  %v1099_v17 = vld [vmem:[#allocation5 + $0x134] ss:$8 sps:$4 sm:$0xff]   ;;  %v1101_v18 = vld [vmem:[#allocation5 + $0x30] ss:$8 sps:$4 sm:$0xff]   ;;  %v1103_v20 = vld [vmem:[#allocation5 + $0x24] ss:$8 sps:$4 sm:$0xff]  }
  0x3e   :  { %537 = vmatpush1.bf16.msra.mxu1 %v1084_v7  ;;  %495 = vmatprep.subr.bf16.mxu0 %v1085_v8  ;;  %v1102_v19 = vld [vmem:[#allocation5 + $0x130] ss:$8 sps:$4 sm:$0xff]   ;;  %v1105_v21 = vld [vmem:[#allocation5 + $0x124] ss:$8 sps:$4 sm:$0xff]   ;;  %v1107_v22 = vld [vmem:[#allocation5 + $0x20] ss:$8 sps:$4 sm:$0xff]  }
  0x3f   :  { %538 = vmatprep.subr.bf16.mxu1 %v1087_v9  ;;  %v1108_v23 = vld [vmem:[#allocation5 + $0x120] ss:$8 sps:$4 sm:$0xff]   ;;  %v1109_v24 = vld [vmem:[#allocation5 + $0x14] ss:$8 sps:$4 sm:$0xff]   ;;  %v1113_v26 = vld [vmem:[#allocation5 + $0x10] ss:$8 sps:$4 sm:$0xff]  }
  0x40   :  { %v1111_v25 = vld [vmem:[#allocation5 + $0x114] ss:$8 sps:$4 sm:$0xff]   ;;  %v1114_v27 = vld [vmem:[#allocation5 + $0x110] ss:$8 sps:$4 sm:$0xff]   ;;  %v1115_v28 = vld [vmem:[#allocation5 + $0x4] ss:$8 sps:$4 sm:$0xff]  }
  0x41   :  { %496 = vmatpush1.bf16.msra.mxu0 %v1089_v10  ;;  %v1117_v29 = vld [vmem:[#allocation5 + $0x104] ss:$8 sps:$4 sm:$0xff]   ;;  %v1119_v30 = vld [vmem:[#allocation5] ss:$8 sps:$4 sm:$0xff]   ;;  %v1121_v32 = vld [vmem:[#allocation5 + $0xf4] ss:$8 sps:$4 sm:$0xff]  }
  0x42   :  { %539 = vmatpush1.bf16.msra.mxu1 %v1090_v11  ;;  %497 = vmatprep.subr.bf16.mxu0 %v1091_v12  ;;  %v1120_v31 = vld [vmem:[#allocation5 + $0x100] ss:$8 sps:$4 sm:$0xff]   ;;  %v1123_v33 = vld [vmem:[#allocation5 + $0x1f4] ss:$8 sps:$4 sm:$0xff]   ;;  %v1125_v34 = vld [vmem:[#allocation5 + $0xf0] ss:$8 sps:$4 sm:$0xff]  }
  0x43   :  { %540 = vmatprep.subr.bf16.mxu1 %v1093_v13  ;;  %v1126_v35 = vld [vmem:[#allocation5 + $0x1f0] ss:$8 sps:$4 sm:$0xff]   ;;  %v1127_v36 = vld [vmem:[#allocation5 + $0xe4] ss:$8 sps:$4 sm:$0xff]   ;;  %v1131_v38 = vld [vmem:[#allocation5 + $0xe0] ss:$8 sps:$4 sm:$0xff]  }
  0x44   :  { %v1129_v37 = vld [vmem:[#allocation5 + $0x1e4] ss:$8 sps:$4 sm:$0xff]   ;;  %v1132_v39 = vld [vmem:[#allocation5 + $0x1e0] ss:$8 sps:$4 sm:$0xff]   ;;  %v1133_v40 = vld [vmem:[#allocation5 + $0xd4] ss:$8 sps:$4 sm:$0xff]  }
  0x45   :  { %498 = vmatpush1.bf16.msra.mxu0 %v1095_v14  ;;  %v1135_v41 = vld [vmem:[#allocation5 + $0x1d4] ss:$8 sps:$4 sm:$0xff]   ;;  %v1137_v42 = vld [vmem:[#allocation5 + $0xd0] ss:$8 sps:$4 sm:$0xff]   ;;  %v1139_v44 = vld [vmem:[#allocation5 + $0xc4] ss:$8 sps:$4 sm:$0xff]  }
  0x46   :  { %541 = vmatpush1.bf16.msra.mxu1 %v1096_v15  ;;  %499 = vmatprep.subr.bf16.mxu0 %v1097_v16  ;;  %v1138_v43 = vld [vmem:[#allocation5 + $0x1d0] ss:$8 sps:$4 sm:$0xff]   ;;  %v1141_v45 = vld [vmem:[#allocation5 + $0x1c4] ss:$8 sps:$4 sm:$0xff]   ;;  %v1143_v50 = vld [vmem:[#allocation5 + $0xc0] ss:$8 sps:$4 sm:$0xff]  }
  0x47   :  { %542 = vmatprep.subr.bf16.mxu1 %v1099_v17  ;;  %v84_v46 = vld [vmem:[#allocation2 + $0x8] sm:$0xff]  ;;  %v86_v48 = vld [vmem:[#allocation2 + $0x18] sm:$0xff]  ;;  %v83_v6 = vld [vmem:[#allocation2] sm:$0xff]  ;;  %vm1320_vm0 = vmmov 0   ;;  %vm897_vm2 = vcmask 130048  }
  0x48   :  { %v88_v47 = vld [vmem:[#allocation2 + $0x28] sm:$0xff]  ;;  %v90_v49 = vld [vmem:[#allocation2 + $0x38] sm:$0xff]  ;;  %v87_v7 = vld [vmem:[#allocation2 + $0x20] sm:$0xff] }
  0x49   :  { %500 = vmatpush1.bf16.msra.mxu0 %v1101_v18  ;;  %v1144_v51 = vld [vmem:[#allocation5 + $0x1c0] ss:$8 sps:$4 sm:$0xff]   ;;  %v1145_v52 = vld [vmem:[#allocation5 + $0xb4] ss:$8 sps:$4 sm:$0xff]   ;;  %v92_v53 = vpack.c.bf16 %v88_v47, %v84_v46  ;;  %v94_v54 = vpack.c.bf16 %v90_v49, %v86_v48  ;;  %v1149_v56 = vld [vmem:[#allocation5 + $0xb0] ss:$8 sps:$4 sm:$0xff]   ;;  %v91_v11 = vpack.c.bf16 %v87_v7, %v83_v6 }
  0x4a   :  { %543 = vmatpush1.bf16.msra.mxu1 %v1102_v19  ;;  %501 = vmatprep.subr.bf16.mxu0 %v1103_v20  ;;  %v1147_v55 = vld [vmem:[#allocation5 + $0x1b4] ss:$8 sps:$4 sm:$0xff]   ;;  %v1150_v57 = vld [vmem:[#allocation5 + $0x1b0] ss:$8 sps:$4 sm:$0xff]   ;;  %v1151_v58 = vld [vmem:[#allocation5 + $0xa4] ss:$8 sps:$4 sm:$0xff]  }
  0x4b   :  { %544 = vmatprep.subr.bf16.mxu1 %v1105_v21  ;;  %523 = vmatprep.mubr.bf16.mxu0 %v92_v53  ;;  %v1153_v59 = vld [vmem:[#allocation5 + $0x1a4] ss:$8 sps:$4 sm:$0xff]   ;;  %v1155_v60 = vld [vmem:[#allocation5 + $0xa0] ss:$8 sps:$4 sm:$0xff]   ;;  %v1157_v62 = vld [vmem:[#allocation5 + $0x94] ss:$8 sps:$4 sm:$0xff]  }
  0x4c   :  { %566 = vmatprep.mubr.bf16.mxu1 %v94_v54  ;;  %v1156_v61 = vld [vmem:[#allocation5 + $0x1a0] ss:$8 sps:$4 sm:$0xff]   ;;  %v1159_v63 = vld [vmem:[#allocation5 + $0x194] ss:$8 sps:$4 sm:$0xff]   ;;  %v1161_v0 = vld [vmem:[#allocation5 + $0x90] ss:$8 sps:$4 sm:$0xff]  }
  0x4d   :  { %502 = vmatpush1.bf16.msra.mxu0 %v1107_v22  ;;  %v1162_v1 = vld [vmem:[#allocation5 + $0x190] ss:$8 sps:$4 sm:$0xff]   ;;  %v1163_v2 = vld [vmem:[#allocation5 + $0x84] ss:$8 sps:$4 sm:$0xff]   ;;  %v1167_v4 = vld [vmem:[#allocation5 + $0x80] ss:$8 sps:$4 sm:$0xff]  }
  0x4e   :  { %545 = vmatpush1.bf16.msra.mxu1 %v1108_v23  ;;  %503 = vmatprep.subr.bf16.mxu0 %v1109_v24  ;;  %v1165_v3 = vld [vmem:[#allocation5 + $0x184] ss:$8 sps:$4 sm:$0xff]   ;;  %v1168_v5 = vld [vmem:[#allocation5 + $0x180] ss:$8 sps:$4 sm:$0xff]   ;;  %v85_v8 = vld [vmem:[#allocation2 + $0x10] sm:$0xff] }
  0x4f   :  { %546 = vmatprep.subr.bf16.mxu1 %v1111_v25  ;;  %v89_v9 = vld [vmem:[#allocation2 + $0x30] sm:$0xff]  ;;  %v1169_v10 = vld [vmem:[#allocation7 + $0x78] sm:$0xff]   ;;  %v1173_v16 = vld [vmem:[#allocation7 + $0x68] sm:$0xff]  }
  0x50   :  { %v93_v12 = vpack.c.bf16 %v89_v9, %v85_v8  ;;  %v1170_v13 = vld [vmem:[#allocation7 + $0x38] sm:$0xff]   ;;  %v1171_v14 = vld [vmem:[#allocation7 + $0x70] sm:$0xff]   ;;  %v1174_v17 = vld [vmem:[#allocation7 + $0x28] sm:$0xff]  }
  0x51   :  { %504 = vmatpush1.bf16.msra.mxu0 %v1113_v26  ;;  %v1172_v15 = vld [vmem:[#allocation7 + $0x30] sm:$0xff]   ;;  %v1175_v18 = vld [vmem:[#allocation7 + $0x60] sm:$0xff]   ;;  %v1177_v20 = vld [vmem:[#allocation7 + $0x58] sm:$0xff]  }
  0x52   :  { %547 = vmatpush1.bf16.msra.mxu1 %v1114_v27  ;;  %505 = vmatprep.subr.bf16.mxu0 %v1115_v28  ;;  %v1176_v19 = vld [vmem:[#allocation7 + $0x20] sm:$0xff]   ;;  %v1178_v21 = vld [vmem:[#allocation7 + $0x18] sm:$0xff]   ;;  %v1179_v22 = vld [vmem:[#allocation7 + $0x50] sm:$0xff]  }
  0x53   :  { %548 = vmatprep.subr.bf16.mxu1 %v1117_v29  ;;  %v1180_v23 = vld [vmem:[#allocation7 + $0x10] sm:$0xff]   ;;  %v1181_v24 = vld [vmem:[#allocation7 + $0x48] sm:$0xff]   ;;  %v1183_v26 = vld [vmem:[#allocation7 + $0x40] sm:$0xff]   ;;  %v1319_v29 = vmov 0.0  }
  0x54   :  { %v1182_v25 = vld [vmem:[#allocation7 + $0x8] sm:$0xff]   ;;  %v1184_v27 = vld [vmem:[#allocation7] sm:$0xff]   ;;  %v1185_v28 = vld [vmem:[#allocation8 + $0x38] sm:$0xff]  }
  0x55   :  { %506 = vmatpush1.bf16.msra.mxu0 %v1119_v30  ;;  %v1186_v30 = vld [vmem:[#allocation8 + $0x30] sm:$0xff]  }
  0x56   :  { %549 = vmatpush1.bf16.msra.mxu1 %v1120_v31  ;;  %507 = vmatprep.subr.bf16.mxu0 %v1121_v32  ;;  %v1187_v31 = vld [vmem:[#allocation8 + $0x28] sm:$0xff]   ;;  %v1188_v32 = vld [vmem:[#allocation8 + $0x20] sm:$0xff]  }
  0x57   :  { %550 = vmatprep.subr.bf16.mxu1 %v1123_v33  ;;  %v161_v33 = vlaneseq }
  0x59   :  { %508 = vmatpush2.bf16.msra.mxu0 %v1125_v34  ;;  %v162_v34 = vshrl.u32 %v161_v33, 7 }
  0x5a   :  { %551 = vmatpush2.bf16.msra.mxu1 %v1126_v35  ;;  %509 = vmatprep.subr.bf16.mxu0 %v1127_v36 }
  0x5b   :  { %552 = vmatprep.subr.bf16.mxu1 %v1129_v37  ;;  %v167_v35 = vsub.s32 1, %v162_v34  ;;  %v163_v36 = vsub.s32 0, %v162_v34  ;;  %v159_v37 = vld [vmem:[%s1396_s2] sm:$0x3] }
  0x5d   :  { %510 = vmatpush2.bf16.msra.mxu0 %v1131_v38  ;;  %v168_v38 = vrot.slane %v159_v37, %v167_v35 }
  0x5e   :  { %553 = vmatpush2.bf16.msra.mxu1 %v1132_v39  ;;  %511 = vmatprep.subr.bf16.mxu0 %v1133_v40  ;;  %v164_v39 = vrot.slane %v159_v37, %v163_v36 }
  0x5f   :  { %554 = vmatprep.subr.bf16.mxu1 %v1135_v41 }
  0x61   :  { %512 = vmatpush2.bf16.msra.mxu0 %v1137_v42 }
  0x62   :  { %555 = vmatpush2.bf16.msra.mxu1 %v1138_v43  ;;  %513 = vmatprep.subr.bf16.mxu0 %v1139_v44 }
  0x63   :  { %556 = vmatprep.subr.bf16.mxu1 %v1141_v45 }
  0x65   :  { %514 = vmatpush2.bf16.msra.mxu0 %v1143_v50 }
  0x66   :  { %557 = vmatpush2.bf16.msra.mxu1 %v1144_v51  ;;  %515 = vmatprep.subr.bf16.mxu0 %v1145_v52 }
  0x67   :  { %558 = vmatprep.subr.bf16.mxu1 %v1147_v55 }
  0x69   :  { %516 = vmatpush2.bf16.msra.mxu0 %v1149_v56 }
  0x6a   :  { %559 = vmatpush2.bf16.msra.mxu1 %v1150_v57  ;;  %517 = vmatprep.subr.bf16.mxu0 %v1151_v58 }
  0x6b   :  { %560 = vmatprep.subr.bf16.mxu1 %v1153_v59 }
  0x6d   :  { %518 = vmatpush2.bf16.msra.mxu0 %v1155_v60 }
  0x6e   :  { %561 = vmatpush2.bf16.msra.mxu1 %v1156_v61  ;;  %519 = vmatprep.subr.bf16.mxu0 %v1157_v62  ;;  %v1189_v62 = vld [vmem:[#allocation8 + $0x18] sm:$0xff]  }
  0x6f   :  { %562 = vmatprep.subr.bf16.mxu1 %v1159_v63  ;;  %v1190_v63 = vld [vmem:[#allocation8 + $0x10] sm:$0xff]  }
  0x71   :  { %520 = vmatpush2.bf16.msra.mxu0 %v1161_v0  ;;  %v1191_v0 = vld [vmem:[#allocation8 + $0x8] sm:$0xff]  }
  0x72   :  { %563 = vmatpush2.bf16.msra.mxu1 %v1162_v1  ;;  %521 = vmatprep.subr.bf16.mxu0 %v1163_v2  ;;  %v1192_v1 = vld [vmem:[#allocation8] sm:$0xff]  }
  0x73   :  { %564 = vmatprep.subr.bf16.mxu1 %v1165_v3 }
  0x75   :  { %522 = vmatpush2.bf16.msra.mxu0 %v1167_v4 }
  0x76   :  { %565 = vmatpush2.bf16.msra.mxu1 %v1168_v5  ;;  %1009 = vmatprep.subr.bf16.mxu0 %v1169_v10  ;;  %v983_v5 = vld [vmem:[%s1398_s4] ss:$0 sm:$0xff]  ;;  %s1321_s4 = smov [#allocation10]  }
  0x77   :  { %1040 = vmatprep.subr.bf16.mxu1 %v1319_v29 }
  0x78   :  { %524 = vmatmul.mubr.bf16.vlgmr.msra.gmra.mxu0 %v91_v11 }
  0x79   :  { %567 = vmatmul.mubr.bf16.vlgmr.msra.gmra.mxu1 %v93_v12  ;;  %1010 = vmatpush3.bf16.msra.mxu0 %v1170_v13 }
  0x7a   :  { %1011 = vmatprep.subr.bf16.mxu0 %v1171_v14  ;;  %1041 = vmatpush3.bf16.msra.mxu1 %v1185_v28  ;;  %v1000_v14 = vld [vmem:[%s1400_s6] ss:$0 sm:$0xff]  ;;  %s905_s6 = sshll.u32 %s1321_s4, 4  ;;  %s906_s6 = int_to_ptr.vmem [resolvable:$true] %s905_s6 }
  0x7b   :  { %1042 = vmatprep.subr.bf16.mxu1 %v1319_v29  ;;  %1056 = vmatprep.mubr.msk.bf16.mxu1 %vm1320_vm0, %v1319_v29  ;;  %s1281_s30 = scalar_lea.vmem %s906_s6, 256  ;;  %p1286_p7 = scmp.lt.s32.totalorder %s906_s6, %s906_s6 }
  0x7c   :  { %p1282_p6 = scmp.ne.s32.totalorder %s906_s6, %s1281_s30  ;;  %p1287_p8 = scmp.lt.s32.totalorder %s1281_s30, %s1281_s30 }
  0x7d   :  { %1012 = vmatpush3.bf16.msra.mxu0 %v1172_v15 }
  0x7e   :  { %1013 = vmatprep.subr.bf16.mxu0 %v1173_v16  ;;  %1043 = vmatpush3.bf16.msra.mxu1 %v1186_v30  ;;  %p1288_p9 = por %p1287_p8, %p1286_p7 }
  0x7f   :  { %1044 = vmatprep.subr.bf16.mxu1 %v1319_v29 }
  0x80   :  { %p1289_p10 = pnand %p1288_p9, %p1282_p6 }
  0x81   :  { %1014 = vmatpush3.bf16.msra.mxu0 %v1174_v17 }
  0x82   :  { %1015 = vmatprep.subr.bf16.mxu0 %v1175_v18  ;;  %1045 = vmatpush3.bf16.msra.mxu1 %v1187_v31 }
  0x83   :  { %1046 = vmatprep.subr.bf16.mxu1 %v1319_v29 }
  0x85   :  { %1016 = vmatpush3.bf16.msra.mxu0 %v1176_v19 }
  0x86   :  { %1017 = vmatprep.subr.bf16.mxu0 %v1177_v20  ;;  %1047 = vmatpush3.bf16.msra.mxu1 %v1188_v32 }
  0x87   :  { %1048 = vmatprep.subr.bf16.mxu1 %v1319_v29 }
  0x89   :  { %1018 = vmatpush3.bf16.msra.mxu0 %v1178_v21 }
  0x8a   :  { %1019 = vmatprep.subr.bf16.mxu0 %v1179_v22  ;;  %1049 = vmatpush3.bf16.msra.mxu1 %v1189_v62 }
  0x8b   :  { %1050 = vmatprep.subr.bf16.mxu1 %v1319_v29 }
  0x8d   :  { %1020 = vmatpush3.bf16.msra.mxu0 %v1180_v23 }
  0x8e   :  { %1021 = vmatprep.subr.bf16.mxu0 %v1181_v24  ;;  %1051 = vmatpush3.bf16.msra.mxu1 %v1190_v63 }
  0x8f   :  { %1052 = vmatprep.subr.bf16.mxu1 %v1319_v29 }
  0x91   :  { %1022 = vmatpush3.bf16.msra.mxu0 %v1182_v25 }
  0x92   :  { %1023 = vmatprep.subr.bf16.mxu0 %v1183_v26  ;;  %1053 = vmatpush3.bf16.msra.mxu1 %v1191_v0 }
  0x93   :  { %1054 = vmatprep.subr.bf16.mxu1 %v1319_v29 }
  0x95   :  { %1024 = vmatpush3.bf16.msra.mxu0 %v1184_v27  ;;  %v885_v27 = vand.u32 127, %v161_v33 }
  0x96   :  { %1055 = vmatpush3.bf16.msra.mxu1 %v1192_v1 }
  0x97   :  { %vm886_vm1 = vcmp.lt.s32.totalorder %v885_v27, 16 }
 0x138   :  { %v525_v40 = vpop.f32.mrf.mxu0 }
 0x139   :  { %v568_v41 = vpop.f32.mrf.mxu1  ;;  %v526_v45 = vadd.f32 %v525_v40, %v164_v39 }
 0x13a   :  { %v527_v42 = vpop.f32.mrf.mxu0 }
 0x13b   :  { %v570_v43 = vpop.f32.mrf.mxu1  ;;  %v528_v44 = vadd.f32 %v527_v42, %v168_v38  ;;  %v569_v53 = vadd.f32 %v568_v41, %v526_v45 }
 0x13c   :  { %v529_v46 = vpop.f32.mrf.mxu0 }
 0x13d   :  { %v572_v47 = vpop.f32.mrf.mxu1  ;;  %v530_v48 = vadd.f32 %v529_v46, %v164_v39  ;;  %v571_v50 = vadd.f32 %v570_v43, %v528_v44  ;;  %v577_v59 = vmax.f32 %v569_v53, 0.0 }
 0x13e   :  { %v531_v49 = vpop.f32.mrf.mxu0 }
 0x13f   :  { %v573_v51 = vadd.f32 %v572_v47, %v530_v48  ;;  %v532_v52 = vadd.f32 %v531_v49, %v168_v38  ;;  %v574_v54 = vpop.f32.mrf.mxu1  ;;  %v578_v57 = vmax.f32 %v571_v50, 0.0 }
 0x141   :  { %v575_v55 = vadd.f32 %v574_v54, %v532_v52  ;;  %v579_v56 = vmax.f32 %v573_v51, 0.0 }
 0x143   :  { %v580_v58 = vmax.f32 %v575_v55, 0.0  ;;  %v581_v61 = vpack.c.bf16 %v579_v56, %v577_v59 }
 0x145   :  { %v582_v60 = vpack.c.bf16 %v580_v58, %v578_v57 }
 0x147   :  { %750 = vmatprep.mubr.bf16.mxu0 %v582_v60 }
 0x148   :  { %751 = vmatmul.mubr.bf16.vlgmr.msra.gmra.mxu0 %v581_v61 }
 0x208   :  { %v1025_v2 = vpop.f32.mrf.mxu0 }
 0x20a   :  { %v1026_v3 = vpop.f32.mrf.mxu0 }
 0x20b   :  { %v1027_v4 = vadd.f32 %v1026_v3, %v1025_v2 }
 0x20c   :  { %v1028_v6 = vpop.f32.mrf.mxu0 }
 0x20d   :  { %v753_v8 = vadd.f32 %v1027_v4, %v983_v5 }
 0x20e   :  { %v1029_v7 = vpop.f32.mrf.mxu0 }
 0x20f   :  { %v1030_v9 = vadd.f32 %v1029_v7, %v1028_v6  ;;  %v759_v11 = vmax.f32 %v753_v8, 0.0 }
 0x211   :  { %v756_v10 = vadd.f32 %v1030_v9, %v983_v5 }
 0x213   :  { %v760_v12 = vmax.f32 %v756_v10, 0.0 }
 0x215   :  { %v761_v13 = vpack.c.bf16 %v760_v12, %v759_v11 }
 0x217   :  { %1057 = vmatmul.mubr.bf16.vlgmr.msra.gmra.mxu1 %v761_v13 }
 0x2d7   :  { %v867_v15 = vpop.f32.mrf.mxu1 }
 0x2d8   :  { %v868_v16 = vadd.f32 %v1000_v14, %v867_v15 }
 0x2d9   :  { %v1058_v17 = vpop.f32.mrf.mxu1 }
 0x2da   :  { %874 = vmax.xlane.f32.xlu0 %v868_v16 }
 0x2db   :  { %v870_v18 = vpop.f32.mrf.mxu1 }
 0x2dc   :  { %v871_v19 = vadd.f32 %v1000_v14, %v870_v18 }
 0x2dd   :  { %v1059_v20 = vpop.f32.mrf.mxu1 }
 0x2de   :  { %876 = vmax.xlane.f32.xlu0 %v871_v19 }
 0x363   :  { %v875_v21 = vpop.xlane.xlu0 %874 }
 0x364   :  { %v878_v22 = vsub.f32 %v868_v16, %v875_v21 }
 0x366   :  { %v880_v23 = vmul.f32 1.442695, %v878_v22 }
 0x367   :  { %v877_v24 = vpop.xlane.xlu0 %876 }
 0x368   :  { %1193 = vpow2.f32 %v880_v23  ;;  %v879_v25 = vsub.f32 %v871_v19, %v877_v24 }
 0x36a   :  { %v882_v26 = vmul.f32 1.442695, %v879_v25 }
 0x36c   :  { %1195 = vpow2.f32 %v882_v26 }
 0x375   :  { %v1194_v28 = vpop.eup %1193 }
 0x376   :  { %v887_v29 = vsel %vm886_vm1, %v1194_v28, 0.0 }
 0x377   :  { %889 = vadd.xlane.f32.xlu1 %v887_v29 }
 0x379   :  { %v1196_v30 = vpop.eup %1195 }
 0x37a   :  { %v888_v31 = vsel %vm886_vm1, %v1196_v30, 0.0 }
 0x37b   :  { %891 = vadd.xlane.f32.xlu1 %v888_v31 }
 0x400   :  { %v890_v32 = vpop.xlane.xlu1 %889 }
 0x401   :  { %1197 = vrcp.f32 %v890_v32 }
 0x404   :  { %v892_v34 = vpop.xlane.xlu1 %891 }
 0x405   :  { %1199 = vrcp.f32 %v892_v34 }
 0x40e   :  { %v1198_v35 = vpop.eup %1197 }
 0x40f   :  { %v895_v36 = vmul.f32 %v1198_v35, %v887_v29 }
 0x411   :  { %898 = vst.msk [vmem:[#allocation10] sm:$0xff] %vm897_vm2, %v895_v36 }
 0x412   :  { %v1200_v37 = vpop.eup %1199 }
 0x413   :  { %v896_v38 = vmul.f32 %v1200_v37, %v888_v31 }
 0x415   :  { %899 = vst.msk [vmem:[#allocation10 + $0x8] sm:$0xff] %vm897_vm2, %v896_v38 }
 0x416   :  { %1292 = shalt.err (!%p1289_p10)
}
 0x417   :  { %911 = dma.vmem_to_hbm [thread:$0]  %s906_s6, 256, %s1401_s7, [#allocation4], %s1310_s27, %s1310_s27, %s1311_s28  }
 0x418   :  { %1307 = dma.done.wait [#allocation4], 256  }
 0x419   :  { %1308 = vsyncadd [#allocation4], 4294967040 }
 0x41a   :  { %915 = vsyncpa [#allocation3], 1 }
 0x41b   :  { %916 = vsyncpa [#allocation6], 1 }
 0x41c   :  { %917 = vsyncpa [#allocation9], 1 }
 0x41d   :  { %918 = vsyncpa [#allocation4], 1 }

</bundles_post_ra>
